<compile_context>
chip_gen: v7x
topology: tpu7x:2x2x1
jax: 0.10.0
libtpu: 0.0.40
codegen_flags: <defaults>
</compile_context>

<pallas_src>
import jax
import jax.numpy as jnp
from jax.experimental import pallas as pl
from jax.experimental.pallas import tpu as pltpu


def _round_up(n: int, m: int) -> int:
    return ((n + m - 1) // m) * m


def mlp_kernel(x_ref, w1t_ref, b1_ref, w2t_ref, b2_ref, oT_ref):
    """One batch tile of tanh(tanh(x @ W1 + b1) @ W2 + b2), computed transposed.

    x_ref  : (Bt, 17)  natural-layout input tile (batch on sublanes)
    w1t_ref: (8, 17)   W1^T        b1_ref: (8, 1)
    w2t_ref: (6, 8)    W2^T        b2_ref: (6, 1)
    oT_ref : (6, Bt)   lane-dense output tile (batch on lanes)
    """
    # Contract the 17-dims of W1^T (8,17) and x (Bt,17) -> H^T = (8, Bt).
    h = jax.lax.dot_general(
        w1t_ref[...], x_ref[...],
        dimension_numbers=(((1,), (1,)), ((), ())),
        preferred_element_type=jnp.float32)                                # (8, Bt)
    h = jnp.tanh(h + b1_ref[...])                                          # bias lane-broadcast
    y = jnp.dot(w2t_ref[...], h, preferred_element_type=jnp.float32)       # (6, Bt)
    oT_ref[...] = jnp.tanh(y + b2_ref[...]).astype(oT_ref.dtype)           # final torch.tanh


def _choose_batch_tile(B: int, cap: int) -> int:
    """Lane-aligned batch tile.

    - multiple of 128 (lane width), capped so per-buffer VMEM stays modest,
    - large enough that each grid step moves O(1 MB) of HBM traffic,
    - ~half the (rounded) batch for small/medium B so the "parallel" grid axis
      has >= 2 steps and both v7x TensorCores get work.
    """
    cap = max(128, _round_up(cap, 128))
    Bp = _round_up(B, 128)
    if Bp <= 128:
        return 128
    half = _round_up(pl.cdiv(Bp, 2), 128)
    return min(cap, half)


def simple_mlp_forward(x, w1, b1, w2, b2, *, batch_tile=8192):
    """x: (B, 17); w1: (17, 8); b1: (8,); w2: (8, 6); b2: (6,)  ->  (B, 6).

    Weights are stored (in_features, out_features), i.e. y = x @ W + b matches
    PyTorch's x @ weight.T + bias.  The kernel computes in a transposed,
    lane-dense orientation; only trace-time reshapes/transposes of the tiny
    (<=17x8) parameters happen in the wrapper.
    """
    B, in_f = x.shape
    hid = w1.shape[1]
    out_f = w2.shape[1]

    x = x.astype(jnp.float32)            # no-op if already f32
    w1t = w1.T                           # (8, 17)
    w2t = w2.T                           # (6, 8)
    b1c = b1.reshape(hid, 1)             # (8, 1)
    b2c = b2.reshape(out_f, 1)           # (6, 1)

    bt = _choose_batch_tile(B, batch_tile)
    grid = (pl.cdiv(B, bt),)             # ragged last block allowed; no padding copy

    resident = lambda i: (0, 0)          # weights/biases: same block every grid step

    oT = pl.pallas_call(
        mlp_kernel,
        out_shape=jax.ShapeDtypeStruct((out_f, B), jnp.float32),
        grid=grid,
        in_specs=[
            pl.BlockSpec((bt, in_f), lambda i: (i, 0)),   # x tile, natural layout
            pl.BlockSpec((hid, in_f), resident),          # W1^T
            pl.BlockSpec((hid, 1), resident),             # b1
            pl.BlockSpec((out_f, hid), resident),         # W2^T
            pl.BlockSpec((out_f, 1), resident),           # b2
        ],
        out_specs=pl.BlockSpec((out_f, bt), lambda i: (0, i)),  # lane-dense store
        compiler_params=pltpu.CompilerParams(
            dimension_semantics=("parallel",),
            vmem_limit_bytes=32 * 1024 * 1024,
        ),
    )(x, w1t, b1c, w2t, b2c)

    # Kernel emits (6, B); consumers that accept feature-major output can use oT
    # directly.  The .T is layout plumbing XLA fuses into the consumer; kept so
    # the public API matches the PyTorch module's (B, 6) output.
    return oT.T


def init_params(key):
    # Deterministic init mirroring nn.Linear's U(-1/sqrt(fan_in), 1/sqrt(fan_in)).
    k1, k2, k3, k4 = jax.random.split(key, 4)
    in1, out1 = 17, 8
    in2, out2 = 8, 6
    bnd1 = 1.0 / jnp.sqrt(in1)
    bnd2 = 1.0 / jnp.sqrt(in2)
    w1 = jax.random.uniform(k1, (in1, out1), jnp.float32, -bnd1, bnd1)
    b1 = jax.random.uniform(k2, (out1,), jnp.float32, -bnd1, bnd1)
    w2 = jax.random.uniform(k3, (in2, out2), jnp.float32, -bnd2, bnd2)
    b2 = jax.random.uniform(k4, (out2,), jnp.float32, -bnd2, bnd2)
    return w1, b1, w2, b2


def reference_forward(x, w1, b1, w2, b2):
    h = jnp.tanh(x @ w1 + b1)
    return jnp.tanh(h @ w2 + b2)


if __name__ == "__main__":
    key = jax.random.PRNGKey(0)
    k_x, k_x2, k_p = jax.random.split(key, 3)
    w1, b1, w2, b2 = init_params(k_p)

    # Small batch consistent with the module (single ragged tile, grid=(1,)).
    batch = 8
    x = jax.random.normal(k_x, (batch, 17), dtype=jnp.float32)
    out = jax.block_until_ready(simple_mlp_forward(x, w1, b1, w2, b2))
    ref = reference_forward(x, w1, b1, w2, b2)
    assert out.shape == (batch, 6)
    assert jnp.allclose(out, ref, atol=1e-5, rtol=1e-5), "mismatch vs pure-JAX reference"

    # Exercise the multi-step grid (>=2 steps for megacore) + ragged last block.
    batch2 = 1027
    x2 = jax.random.normal(k_x2, (batch2, 17), dtype=jnp.float32)
    out2 = jax.block_until_ready(simple_mlp_forward(x2, w1, b1, w2, b2))
    ref2 = reference_forward(x2, w1, b1, w2, b2)
    assert out2.shape == (batch2, 6)
    assert jnp.allclose(out2, ref2, atol=1e-5, rtol=1e-5), "mismatch on tiled batch"

    print("KERNEL_OK")
</pallas_src>

<mosaic_0001>
module attributes {stable_mosaic.version = 11 : i64} {
  func.func @mlp_kernel(%arg0: i32, %arg1: memref<128x17xf32, #tpu.memory_space<vmem>>, %arg2: memref<8x17xf32, #tpu.memory_space<vmem>>, %arg3: memref<8x1xf32, #tpu.memory_space<vmem>>, %arg4: memref<6x8xf32, #tpu.memory_space<vmem>>, %arg5: memref<6x1xf32, #tpu.memory_space<vmem>>, %arg6: memref<6x128xf32, #tpu.memory_space<vmem>>) attributes {dimension_semantics = [#tpu.dimension_semantics<parallel>], iteration_bounds = array<i64: 1>, scalar_prefetch = 0 : i64, scratch_operands = 0 : i64, tpu.core_type = #tpu.core_type<tc>, window_params = [{transform_indices = @transform_0, window_bounds = array<i64: 128, 17>}, {pipeline_mode = #tpu.pipeline_mode<synchronous>, transform_indices = @transform_1, window_bounds = array<i64: 8, 17>}, {pipeline_mode = #tpu.pipeline_mode<synchronous>, transform_indices = @transform_2, window_bounds = array<i64: 8, 1>}, {pipeline_mode = #tpu.pipeline_mode<synchronous>, transform_indices = @transform_3, window_bounds = array<i64: 6, 8>}, {pipeline_mode = #tpu.pipeline_mode<synchronous>, transform_indices = @transform_4, window_bounds = array<i64: 6, 1>}, {transform_indices = @transform_5, window_bounds = array<i64: 6, 128>}]} {
    %c0 = arith.constant 0 : index
    %c0_0 = arith.constant 0 : index
    %0 = vector.load %arg2[%c0, %c0_0] : memref<8x17xf32, #tpu.memory_space<vmem>>, vector<8x17xf32>
    %c0_1 = arith.constant 0 : index
    %c0_2 = arith.constant 0 : index
    %1 = vector.load %arg1[%c0_1, %c0_2] : memref<128x17xf32, #tpu.memory_space<vmem>>, vector<128x17xf32>
    %cst = arith.constant dense<0.000000e+00> : vector<8x128xf32>
    %2 = tpu.matmul %0, %1, %cst {dimension_numbers = #tpu.dot_dimension_numbers<[1], [1], [0], [0], [0, 0, 1, 0], [], []>} : vector<8x17xf32>, vector<128x17xf32>, vector<8x128xf32> -> vector<8x128xf32>
    %c0_3 = arith.constant 0 : index
    %c0_4 = arith.constant 0 : index
    %3 = vector.load %arg3[%c0_3, %c0_4] : memref<8x1xf32, #tpu.memory_space<vmem>>, vector<8x1xf32>
    %4 = vector.broadcast %3 : vector<8x1xf32> to vector<8x128xf32>
    %5 = arith.addf %2, %4 : vector<8x128xf32>
    %6 = math.tanh %5 : vector<8x128xf32>
    %c0_5 = arith.constant 0 : index
    %c0_6 = arith.constant 0 : index
    %7 = vector.load %arg4[%c0_5, %c0_6] : memref<6x8xf32, #tpu.memory_space<vmem>>, vector<6x8xf32>
    %cst_7 = arith.constant dense<0.000000e+00> : vector<6x128xf32>
    %8 = tpu.matmul %7, %6, %cst_7 {dimension_numbers = #tpu.dot_dimension_numbers<[1], [0], [0], [1], [0, 0, 1, 1], [], []>} : vector<6x8xf32>, vector<8x128xf32>, vector<6x128xf32> -> vector<6x128xf32>
    %c0_8 = arith.constant 0 : index
    %c0_9 = arith.constant 0 : index
    %9 = vector.load %arg5[%c0_8, %c0_9] : memref<6x1xf32, #tpu.memory_space<vmem>>, vector<6x1xf32>
    %10 = vector.broadcast %9 : vector<6x1xf32> to vector<6x128xf32>
    %11 = arith.addf %8, %10 : vector<6x128xf32>
    %12 = math.tanh %11 : vector<6x128xf32>
    %c0_10 = arith.constant 0 : index
    %c0_11 = arith.constant 0 : index
    %13 = vector.load %arg6[%c0_10, %c0_11] : memref<6x128xf32, #tpu.memory_space<vmem>>, vector<6x128xf32>
    tpu.vector_store %arg6[%c0_10, %c0_11], %12 {strides = array<i32>} : memref<6x128xf32, #tpu.memory_space<vmem>>, vector<6x128xf32>,
    return
  }
  func.func @transform_0(%arg0: i32) -> (i32, i32) {
    %c0_i32 = arith.constant 0 : i32
    %c0_i32_0 = arith.constant 0 : i32
    return %arg0, %c0_i32 : i32, i32
  }
  func.func @transform_1(%arg0: i32) -> (i32, i32) {
    %c0_i32 = arith.constant 0 : i32
    %c0_i32_0 = arith.constant 0 : i32
    %c0_i32_1 = arith.constant 0 : i32
    return %c0_i32, %c0_i32_0 : i32, i32
  }
  func.func @transform_2(%arg0: i32) -> (i32, i32) {
    %c0_i32 = arith.constant 0 : i32
    %c0_i32_0 = arith.constant 0 : i32
    %c0_i32_1 = arith.constant 0 : i32
    return %c0_i32, %c0_i32_0 : i32, i32
  }
  func.func @transform_3(%arg0: i32) -> (i32, i32) {
    %c0_i32 = arith.constant 0 : i32
    %c0_i32_0 = arith.constant 0 : i32
    %c0_i32_1 = arith.constant 0 : i32
    return %c0_i32, %c0_i32_0 : i32, i32
  }
  func.func @transform_4(%arg0: i32) -> (i32, i32) {
    %c0_i32 = arith.constant 0 : i32
    %c0_i32_0 = arith.constant 0 : i32
    %c0_i32_1 = arith.constant 0 : i32
    return %c0_i32, %c0_i32_0 : i32, i32
  }
  func.func @transform_5(%arg0: i32) -> (i32, i32) {
    %c0_i32 = arith.constant 0 : i32
    %c0_i32_0 = arith.constant 0 : i32
    return %c0_i32, %arg0 : i32, i32
  }
}

</mosaic_0001>

<bundles_post_ra>
// kernel: tpu_custom_call.1
= control target key start
LH: loop header
LB: loop body
LE: loop exit
PB: predicated region body
PF: predicated region fallthrough
CT: control target
= control target key end

     0   :  { %vm44_vm0 = vcmask 138240   ;;  %v407_v2 = vmov 0.0|0.0   ;;  %vm408_vm2 = vmmov 0   ;;  %v409_v5 = vmov 0.0   ;;  %s537_s0 = inlined_call_operand.vmem [shape: f32[8,17], index: 0, kind: input, shape index: {}]   ;;  %s538_s1 = inlined_call_operand.vmem [shape: f32[8,17], index: 1, kind: input, shape index: {}]   ;;  %s539_s2 = inlined_call_operand.vmem [shape: f32[8,1], index: 2, kind: input, shape index: {}]   ;;  %s540_s3 = inlined_call_operand.vmem [shape: f32[6,8], index: 3, kind: input, shape index: {}]   ;;  %s541_s4 = inlined_call_operand.vmem [shape: f32[6,1], index: 4, kind: input, shape index: {}]   ;;  %s542_s5 = inlined_call_operand.hbm [shape: f32[6,8], index: 5, kind: output, shape index: {}]  }
   0x1   :  { %v22_v0 = vld [vmem:[%s537_s0] sm:$0xff]  ;;  %v23_v1 = vld [vmem:[%s537_s0 + $0x8] sm:$0xff]  ;;  %341 = vmatprep.subr.bf16.mxu0 %v407_v2  ;;  %vm450_vm1 = vmpackc.low %vm44_vm0, %vm44_vm0  ;;  %333 = vmatprep.mubr.msk.f32.mxu0 %vm408_vm2, %v409_v5  ;;  %v410_v6 = vmov 0  }
   0x2   :  { %v342_v3 = vpack.c.bf16 %v23_v1, %v22_v0  ;;  %378 = vset.pattern.permute.xlu0 %v410_v6  ;;  %336 = vmatprep.subr.mxu1 %v409_v5  ;;  %v24_v7 = vld [vmem:[%s537_s0 + $0x10] sm:$0xff]  ;;  %v25_v8 = vld [vmem:[%s537_s0 + $0x18] sm:$0xff]  ;;  %v38_v9 = vld [vmem:[%s539_s2] sm:$0xff] }
   0x3   :  { %338 = vmatprep.mubr.msk.f32.mxu1 %vm408_vm2, %v409_v5 }
   0x4   :  { %344 = vmatpush3.bf16.xpose.msk.msra.mxu0 %vm450_vm1, %v342_v3 }
   0x5   :  { %345 = vmatprep.subr.bf16.mxu0 %v407_v2 }
   0x6   :  { %10 = vsyncpa [#allocation3], 0  ;;  %v346_v10 = vpack.c.bf16 %v25_v8, %v24_v7  ;;  %41 = vperm.xlu0 %378, %v38_v9   ;;  %v168_v11 = vld [vmem:[%s541_s4] sm:$0x3f]  ;;  %v27_v13 = vld [vmem:[%s537_s0 + $0x28] sm:$0xff]  ;;  %vm174_vm3 = vcmask 64512  }
   0x7   :  { %v26_v12 = vld [vmem:[%s537_s0 + $0x20] sm:$0xff]  ;;  %v28_v15 = vld [vmem:[%s537_s0 + $0x30] sm:$0xff]  ;;  %v29_v16 = vld [vmem:[%s537_s0 + $0x38] sm:$0xff] }
   0x8   :  { %v350_v14 = vpack.c.bf16 %v27_v13, %v26_v12  ;;  %v354_v17 = vpack.c.bf16 %v29_v16, %v28_v15  ;;  %v30_v18 = vld [vmem:[%s537_s0 + $0x40] sm:$0xff]  ;;  %v31_v19 = vld [vmem:[%s537_s0 + $0x48] sm:$0xff]  ;;  %v32_v21 = vld [vmem:[%s537_s0 + $0x50] sm:$0xff] }
   0x9   :  { %v358_v20 = vpack.c.bf16 %v31_v19, %v30_v18  ;;  %v33_v22 = vld [vmem:[%s537_s0 + $0x58] sm:$0xff]  ;;  %v34_v24 = vld [vmem:[%s537_s0 + $0x60] sm:$0xff]  ;;  %v35_v25 = vld [vmem:[%s537_s0 + $0x68] sm:$0xff] }
   0xa   :  { %171 = vperm.xlu0 %378, %v168_v11   ;;  %v362_v23 = vpack.c.bf16 %v33_v22, %v32_v21  ;;  %v366_v26 = vpack.c.bf16 %v35_v25, %v34_v24  ;;  %v36_v27 = vld [vmem:[%s537_s0 + $0x70] sm:$0xff]  ;;  %v37_v28 = vld [vmem:[%s537_s0 + $0x78] sm:$0xff]  ;;  %v21_v30 = vld [vmem:[%s538_s1] sm:$0xff]  ;;  %s411_s0 = smov [#allocation2]  }
   0xb   :  { %v370_v29 = vpack.c.bf16 %v37_v28, %v36_v27  ;;  %v167_v35 = vld [vmem:[%s540_s3] sm:$0x3f]  ;;  %s256_s1 = sshll.u32 %s411_s0, 4  ;;  %s257_s1 = int_to_ptr.vmem [resolvable:$true] %s256_s1 }
   0xc   :  { %348 = vmatpush3.bf16.xpose.msk.msra.mxu0 %vm450_vm1, %v346_v10  ;;  %s383_s6 = scalar_lea.vmem %s257_s1, 128  ;;  %p388_p1 = scmp.lt.s32.totalorder %s257_s1, %s257_s1 }
   0xd   :  { %349 = vmatprep.subr.bf16.mxu0 %v407_v2  ;;  %p384_p0 = scmp.ne.s32.totalorder %s257_s1, %s383_s6  ;;  %p389_p2 = scmp.lt.s32.totalorder %s383_s6, %s383_s6 }
   0xf   :  { %p390_p3 = por %p389_p2, %p388_p1 }
  0x11   :  { %p391_p4 = pnand %p390_p3, %p384_p0 }
  0x14   :  { %352 = vmatpush3.bf16.xpose.msk.msra.mxu0 %vm450_vm1, %v350_v14 }
  0x15   :  { %353 = vmatprep.subr.bf16.mxu0 %v407_v2 }
  0x1c   :  { %356 = vmatpush3.bf16.xpose.msk.msra.mxu0 %vm450_vm1, %v354_v17 }
  0x1d   :  { %357 = vmatprep.subr.bf16.mxu0 %v407_v2 }
  0x24   :  { %360 = vmatpush3.bf16.xpose.msk.msra.mxu0 %vm450_vm1, %v358_v20 }
  0x25   :  { %361 = vmatprep.subr.bf16.mxu0 %v407_v2 }
  0x2c   :  { %364 = vmatpush3.bf16.xpose.msk.msra.mxu0 %vm450_vm1, %v362_v23 }
  0x2d   :  { %365 = vmatprep.subr.bf16.mxu0 %v407_v2 }
  0x34   :  { %368 = vmatpush3.bf16.xpose.msk.msra.mxu0 %vm450_vm1, %v366_v26 }
  0x35   :  { %369 = vmatprep.subr.bf16.mxu0 %v407_v2 }
  0x3c   :  { %372 = vmatpush3.bf16.xpose.msk.msra.mxu0 %vm450_vm1, %v370_v29 }
  0x43   :  { %334 = vmatmul.mubr.msk.f32.vlgmr.msra.gmra.mrb[0].mxu0 %vm44_vm0, %v21_v30 }
  0x85   :  { %v42_v31 = vpop.permute.xlu0 %41 }
  0x89   :  { %v172_v37 = vpop.permute.xlu0 %171 }
 0x116   :  { %v162_v32 = vpop.f32.mrb[0].mxu0 }
 0x117   :  { %v163_v33 = vadd.f32 %v162_v32, %v42_v31  ;;  %v335_v34 = vpop.f32.mrb[1].mxu0 }
 0x119   :  { %379 = vtanh.f32 %v163_v33 }
 0x123   :  { %v380_v36 = vpop.eup %379 }
 0x124   :  { %337 = vmatpush3.msra.mxu1 %v380_v36 }
 0x125   :  { %339 = vmatmul.mubr.msk.f32.vlgmr.msra.gmra.mrb[0].mxu1 %vm174_vm3, %v167_v35 }
 0x1f8   :  { %v244_v38 = vpop.f32.mrb[0].mxu1 }
 0x1f9   :  { %v245_v39 = vadd.f32 %v244_v38, %v172_v37  ;;  %v340_v40 = vpop.f32.mrb[1].mxu1 }
 0x1fb   :  { %381 = vtanh.f32 %v245_v39 }
 0x205   :  { %v382_v41 = vpop.eup %381 }
 0x206   :  { %249 = vst [vmem:[#allocation2] sm:$0x3f] %v382_v41 }
 0x207   :  { %394 = shalt.err (!%p391_p4)
}
 0x208   :  { %s395_s8 = scalar_lea.hbm %s542_s5, 128 }
 0x209   :  { %p396_p5 = scmp.ne.s32.totalorder %s542_s5, %s395_s8  ;;  %p399_p6 = scmp.lt.u32.totalorder %s395_s8, %s542_s5 }
 0x20b   :  { %p401_p7 = pnand %p399_p6, %p396_p5 }
 0x20d   :  { %404 = shalt.err (!%p401_p7)
}
 0x20e   :  { %259 = dma.vmem_to_hbm [thread:$0]  %s257_s1, 128, %s542_s5, [#allocation3]  }
 0x20f   :  { %405 = dma.done.wait [#allocation3], 128  }
 0x210   :  { %406 = vsyncadd [#allocation3], 4294967168 }
 0x211   :  { %263 = vsyncpa [#allocation3], 1 }

</bundles_post_ra>
